<compile_context>
chip_gen: v7x
topology: tpu7x:2x2x1
jax: 0.10.0
libtpu: 0.0.40
codegen_flags: <defaults>
</compile_context>

<pallas_src>
import jax
import jax.numpy as jnp
from jax.experimental import pallas as pl
from jax.experimental.pallas import tpu as pltpu


def _round_up(n, m):
    return ((n + m - 1) // m) * m


def nn3bow_kernel(x_ref, w1_ref, b1_ref, w2_ref, b2_ref, w3_ref, b3_ref, o_ref):
    x = x_ref[...]                                               # (TB, Din_pad)

    # fc1 + ReLU (MXU matmul in operand dtype, f32 accumulate, f32 elementwise)
    h1 = jnp.dot(x, w1_ref[...], preferred_element_type=jnp.float32) + b1_ref[...]
    h1 = jnp.maximum(h1, 0.0)

    # fc2 + ReLU
    h2 = jnp.dot(h1.astype(w2_ref.dtype), w2_ref[...],
                 preferred_element_type=jnp.float32) + b2_ref[...]
    h2 = jnp.maximum(h2, 0.0)

    # fc3 -> logits (TB, C_pad).  Padded class columns carry bias -1e30 (and
    # zero weights), so they contribute exp(~-1e30) == 0 to the LSE below.
    logits = jnp.dot(h2.astype(w3_ref.dtype), w3_ref[...],
                     preferred_element_type=jnp.float32) + b3_ref[...]

    # LogSoftmax over dim=1 (numerically stable, f32, lane-dense reductions).
    m = jnp.max(logits, axis=1, keepdims=True)
    shifted = logits - m
    lse = jnp.log(jnp.sum(jnp.exp(shifted), axis=1, keepdims=True))
    o_ref[...] = (shifted - lse).astype(o_ref.dtype)


def nn3bow_forward(x, w1, b1, w2, b2, w3, b3, *,
                   block_b=None, compute_dtype=jnp.bfloat16):
    """x: (B, input_size). Weights stored transposed to (in, out); biases (1, out)."""
    B, d_in = x.shape
    hidden = w1.shape[1]
    n_classes = w3.shape[1]

    # --- Lane-pad contraction/output dims to multiples of 128 (all exact). ---
    d_pad = _round_up(d_in, 128)
    h_pad = _round_up(hidden, 128)
    c_pad = _round_up(n_classes, 128)

    if d_pad != d_in:
        dd = d_pad - d_in
        x = jnp.pad(x, ((0, 0), (0, dd)))
        w1 = jnp.pad(w1, ((0, dd), (0, 0)))
    if h_pad != hidden:
        dh = h_pad - hidden
        w1 = jnp.pad(w1, ((0, 0), (0, dh)))
        b1 = jnp.pad(b1, ((0, 0), (0, dh)))
        w2 = jnp.pad(w2, ((0, dh), (0, dh)))
        b2 = jnp.pad(b2, ((0, 0), (0, dh)))
        w3 = jnp.pad(w3, ((0, dh), (0, 0)))
    if c_pad != n_classes:
        dc = c_pad - n_classes
        w3 = jnp.pad(w3, ((0, 0), (0, dc)))                          # zero weights
        b3 = jnp.pad(b3, ((0, 0), (0, dc)), constant_values=-1e30)   # -> exp() == 0

    # --- Cast the bulk GEMM operands; biases / elementwise stay f32. ---
    x_c = x.astype(compute_dtype)
    w1_c = w1.astype(compute_dtype)
    w2_c = w2.astype(compute_dtype)
    w3_c = w3.astype(compute_dtype)
    b1 = b1.astype(jnp.float32)
    b2 = b2.astype(jnp.float32)
    b3 = b3.astype(jnp.float32)

    x_item = jnp.dtype(compute_dtype).itemsize
    w_bytes = sum(int(a.size) * a.dtype.itemsize
                  for a in (w1_c, b1, w2_c, b2, w3_c, b3))

    # --- Per-generation VMEM capacity (v5e/v6e: 128 MiB; v7x: 64 MiB/core). ---
    try:
        vmem_cap = int(pltpu.get_tpu_info().vmem_capacity_bytes)
    except Exception:
        vmem_cap = 64 * 1024 * 1024          # conservative fallback (v7x)
    budget = int(0.6 * vmem_cap)

    # --- Derive the batch tile from the budget (weights stay resident):
    #     2x in-flight x tiles + 2x output tiles + f32 h1/h2/logits. ---
    per_row = 2 * d_pad * x_item + 2 * c_pad * 4 + 3 * h_pad * 4
    cap = 2048 if vmem_cap >= 96 * 1024 * 1024 else 512
    if block_b is None:
        avail = max(budget - w_bytes, per_row)
        block_b = min(avail // per_row, cap, _round_up(B, 16))
    block_b = max(16, (int(block_b) // 16) * 16)   # sublane-safe for bf16 & f32

    b_pad = _round_up(B, block_b)
    if b_pad != B:
        x_c = jnp.pad(x_c, ((0, b_pad - B), (0, 0)))
    grid = (b_pad // block_b,)

    # --- Always set the scoped VMEM limit from the estimate (v5e default is
    #     16 MiB), capped below physical capacity (v7x: 64 MiB). ---
    est = (2 * block_b * d_pad * x_item        # double-buffered x tiles
           + 2 * block_b * c_pad * 4           # double-buffered output tiles
           + w_bytes                           # resident weights/biases
           + 3 * block_b * h_pad * 4)          # f32 intermediates
    vmem_limit = int(min(max(int(est * 1.5), 32 * 1024 * 1024),
                         int(0.9 * vmem_cap)))

    resident = lambda shape: pl.BlockSpec(shape, lambda i: (0, 0))

    out = pl.pallas_call(
        nn3bow_kernel,
        out_shape=jax.ShapeDtypeStruct((b_pad, c_pad), jnp.float32),
        grid=grid,
        in_specs=[
            pl.BlockSpec((block_b, d_pad), lambda i: (i, 0)),   # x: tiled over batch
            resident(w1_c.shape),
            resident(b1.shape),
            resident(w2_c.shape),
            resident(b2.shape),
            resident(w3_c.shape),
            resident(b3.shape),
        ],
        out_specs=pl.BlockSpec((block_b, c_pad), lambda i: (i, 0)),
        compiler_params=pltpu.CompilerParams(
            dimension_semantics=("parallel",),
            vmem_limit_bytes=vmem_limit,
        ),
    )(x_c, w1_c, b1, w2_c, b2, w3_c, b3)

    return out[:B, :n_classes]


def _ref_forward(x, w1, b1, w2, b2, w3, b3):
    h1 = jnp.maximum(x @ w1 + b1, 0.0)
    h2 = jnp.maximum(h1 @ w2 + b2, 0.0)
    logits = h2 @ w3 + b3
    return jax.nn.log_softmax(logits, axis=1)


if __name__ == "__main__":
    # Small shapes consistent with the module: BOW features -> 2 classes.
    input_size = 32
    hidden_size = 32
    n_classes = 2

    key = jax.random.PRNGKey(0)
    kx, kx2, k1, k2, k3, kb1, kb2, kb3 = jax.random.split(key, 8)

    # Parameters mirror nn.Linear, stored transposed to (in, out).
    w1 = jax.random.normal(k1, (input_size, hidden_size), dtype=jnp.float32) * 0.1
    b1 = jax.random.normal(kb1, (1, hidden_size), dtype=jnp.float32) * 0.1
    w2 = jax.random.normal(k2, (hidden_size, hidden_size), dtype=jnp.float32) * 0.1
    b2 = jax.random.normal(kb2, (1, hidden_size), dtype=jnp.float32) * 0.1
    w3 = jax.random.normal(k3, (hidden_size, n_classes), dtype=jnp.float32) * 0.1
    b3 = jax.random.normal(kb3, (1, n_classes), dtype=jnp.float32) * 0.1
    params = (w1, b1, w2, b2, w3, b3)

    x = jax.random.normal(kx, (8, input_size), dtype=jnp.float32)
    ref = _ref_forward(x, *params)

    # 1) f32 GEMM path, tight tolerance.
    out_f32 = jax.block_until_ready(
        nn3bow_forward(x, *params, compute_dtype=jnp.float32))
    assert out_f32.shape == (8, n_classes)
    assert jnp.allclose(out_f32, ref, atol=1e-5, rtol=1e-5), "f32 mismatch vs reference"

    # 2) f32 path, ragged batch (exercises batch padding + slice).
    x2 = jax.random.normal(kx2, (13, input_size), dtype=jnp.float32)
    out2 = jax.block_until_ready(
        nn3bow_forward(x2, *params, block_b=16, compute_dtype=jnp.float32))
    ref2 = _ref_forward(x2, *params)
    assert out2.shape == (13, n_classes)
    assert jnp.allclose(out2, ref2, atol=1e-5, rtol=1e-5), "ragged-batch mismatch"

    # 3) default bf16 GEMM-operand path (f32 accumulation), looser tolerance.
    out_bf16 = jax.block_until_ready(nn3bow_forward(x, *params))
    assert out_bf16.shape == (8, n_classes)
    assert jnp.allclose(out_bf16, ref, atol=5e-2, rtol=5e-2), "bf16 mismatch"

    print("KERNEL_OK")
</pallas_src>

<mosaic_0001>
module attributes {stable_mosaic.version = 11 : i64} {
  func.func @nn3bow_kernel(%arg0: i32, %arg1: memref<16x128xf32, #tpu.memory_space<vmem>>, %arg2: memref<128x128xf32, #tpu.memory_space<vmem>>, %arg3: memref<1x128xf32, #tpu.memory_space<vmem>>, %arg4: memref<128x128xf32, #tpu.memory_space<vmem>>, %arg5: memref<1x128xf32, #tpu.memory_space<vmem>>, %arg6: memref<128x128xf32, #tpu.memory_space<vmem>>, %arg7: memref<1x128xf32, #tpu.memory_space<vmem>>, %arg8: memref<16x128xf32, #tpu.memory_space<vmem>>) attributes {dimension_semantics = [#tpu.dimension_semantics<parallel>], iteration_bounds = array<i64: 1>, scalar_prefetch = 0 : i64, scratch_operands = 0 : i64, tpu.core_type = #tpu.core_type<tc>, window_params = [{transform_indices = @transform_0, window_bounds = array<i64: 16, 128>}, {pipeline_mode = #tpu.pipeline_mode<synchronous>, transform_indices = @transform_1, window_bounds = array<i64: 128, 128>}, {pipeline_mode = #tpu.pipeline_mode<synchronous>, transform_indices = @transform_2, window_bounds = array<i64: 1, 128>}, {pipeline_mode = #tpu.pipeline_mode<synchronous>, transform_indices = @transform_3, window_bounds = array<i64: 128, 128>}, {pipeline_mode = #tpu.pipeline_mode<synchronous>, transform_indices = @transform_4, window_bounds = array<i64: 1, 128>}, {pipeline_mode = #tpu.pipeline_mode<synchronous>, transform_indices = @transform_5, window_bounds = array<i64: 128, 128>}, {pipeline_mode = #tpu.pipeline_mode<synchronous>, transform_indices = @transform_6, window_bounds = array<i64: 1, 128>}, {transform_indices = @transform_7, window_bounds = array<i64: 16, 128>}]} {
    %c0 = arith.constant 0 : index
    %c0_0 = arith.constant 0 : index
    %0 = vector.load %arg1[%c0, %c0_0] : memref<16x128xf32, #tpu.memory_space<vmem>>, vector<16x128xf32>
    %c0_1 = arith.constant 0 : index
    %c0_2 = arith.constant 0 : index
    %1 = vector.load %arg2[%c0_1, %c0_2] : memref<128x128xf32, #tpu.memory_space<vmem>>, vector<128x128xf32>
    %cst = arith.constant dense<0.000000e+00> : vector<16x128xf32>
    %2 = tpu.matmul %0, %1, %cst {dimension_numbers = #tpu.dot_dimension_numbers<[1], [0], [0], [1], [0, 0, 1, 1], [], []>} : vector<16x128xf32>, vector<128x128xf32>, vector<16x128xf32> -> vector<16x128xf32>
    %c0_3 = arith.constant 0 : index
    %c0_4 = arith.constant 0 : index
    %3 = vector.load %arg3[%c0_3, %c0_4] : memref<1x128xf32, #tpu.memory_space<vmem>>, vector<1x128xf32>
    %4 = vector.broadcast %3 : vector<1x128xf32> to vector<16x128xf32>
    %5 = arith.addf %2, %4 : vector<16x128xf32>
    %cst_5 = arith.constant 0.000000e+00 : f32
    %6 = vector.broadcast %cst_5 : f32 to vector<16x128xf32>
    %7 = arith.maximumf %5, %6 : vector<16x128xf32>
    %c0_6 = arith.constant 0 : index
    %c0_7 = arith.constant 0 : index
    %8 = vector.load %arg4[%c0_6, %c0_7] : memref<128x128xf32, #tpu.memory_space<vmem>>, vector<128x128xf32>
    %cst_8 = arith.constant dense<0.000000e+00> : vector<16x128xf32>
    %9 = tpu.matmul %7, %8, %cst_8 {dimension_numbers = #tpu.dot_dimension_numbers<[1], [0], [0], [1], [0, 0, 1, 1], [], []>} : vector<16x128xf32>, vector<128x128xf32>, vector<16x128xf32> -> vector<16x128xf32>
    %c0_9 = arith.constant 0 : index
    %c0_10 = arith.constant 0 : index
    %10 = vector.load %arg5[%c0_9, %c0_10] : memref<1x128xf32, #tpu.memory_space<vmem>>, vector<1x128xf32>
    %11 = vector.broadcast %10 : vector<1x128xf32> to vector<16x128xf32>
    %12 = arith.addf %9, %11 : vector<16x128xf32>
    %cst_11 = arith.constant 0.000000e+00 : f32
    %13 = vector.broadcast %cst_11 : f32 to vector<16x128xf32>
    %14 = arith.maximumf %12, %13 : vector<16x128xf32>
    %c0_12 = arith.constant 0 : index
    %c0_13 = arith.constant 0 : index
    %15 = vector.load %arg6[%c0_12, %c0_13] : memref<128x128xf32, #tpu.memory_space<vmem>>, vector<128x128xf32>
    %cst_14 = arith.constant dense<0.000000e+00> : vector<16x128xf32>
    %16 = tpu.matmul %14, %15, %cst_14 {dimension_numbers = #tpu.dot_dimension_numbers<[1], [0], [0], [1], [0, 0, 1, 1], [], []>} : vector<16x128xf32>, vector<128x128xf32>, vector<16x128xf32> -> vector<16x128xf32>
    %c0_15 = arith.constant 0 : index
    %c0_16 = arith.constant 0 : index
    %17 = vector.load %arg7[%c0_15, %c0_16] : memref<1x128xf32, #tpu.memory_space<vmem>>, vector<1x128xf32>
    %18 = vector.broadcast %17 : vector<1x128xf32> to vector<16x128xf32>
    %19 = arith.addf %16, %18 : vector<16x128xf32>
    %cst_17 = arith.constant dense<0xFF800000> : vector<16xf32>
    %20 = vector.multi_reduction <maximumf>, %19, %cst_17 [1] : vector<16x128xf32> to vector<16xf32>
    %21 = vector.shape_cast %20 : vector<16xf32> to vector<16x1xf32>
    %22 = vector.broadcast %21 : vector<16x1xf32> to vector<16x128xf32>
    %23 = arith.subf %19, %22 : vector<16x128xf32>
    %24 = math.exp %23 : vector<16x128xf32>
    %cst_18 = arith.constant dense<0.000000e+00> : vector<16xf32>
    %25 = vector.multi_reduction <add>, %24, %cst_18 [1] : vector<16x128xf32> to vector<16xf32>
    %26 = vector.shape_cast %25 : vector<16xf32> to vector<16x1xf32>
    %27 = math.log %26 : vector<16x1xf32>
    %28 = vector.broadcast %27 : vector<16x1xf32> to vector<16x128xf32>
    %29 = arith.subf %23, %28 : vector<16x128xf32>
    %c0_19 = arith.constant 0 : index
    %c0_20 = arith.constant 0 : index
    %30 = vector.load %arg8[%c0_19, %c0_20] : memref<16x128xf32, #tpu.memory_space<vmem>>, vector<16x128xf32>
    tpu.vector_store %arg8[%c0_19, %c0_20], %29 {strides = array<i32>} : memref<16x128xf32, #tpu.memory_space<vmem>>, vector<16x128xf32>,
    return
  }
  func.func @transform_0(%arg0: i32) -> (i32, i32) {
    %c0_i32 = arith.constant 0 : i32
    %c0_i32_0 = arith.constant 0 : i32
    return %arg0, %c0_i32 : i32, i32
  }
  func.func @transform_1(%arg0: i32) -> (i32, i32) {
    %c0_i32 = arith.constant 0 : i32
    %c0_i32_0 = arith.constant 0 : i32
    %c0_i32_1 = arith.constant 0 : i32
    return %c0_i32, %c0_i32_0 : i32, i32
  }
  func.func @transform_2(%arg0: i32) -> (i32, i32) {
    %c0_i32 = arith.constant 0 : i32
    %c0_i32_0 = arith.constant 0 : i32
    %c0_i32_1 = arith.constant 0 : i32
    return %c0_i32, %c0_i32_0 : i32, i32
  }
  func.func @transform_3(%arg0: i32) -> (i32, i32) {
    %c0_i32 = arith.constant 0 : i32
    %c0_i32_0 = arith.constant 0 : i32
    %c0_i32_1 = arith.constant 0 : i32
    return %c0_i32, %c0_i32_0 : i32, i32
  }
  func.func @transform_4(%arg0: i32) -> (i32, i32) {
    %c0_i32 = arith.constant 0 : i32
    %c0_i32_0 = arith.constant 0 : i32
    %c0_i32_1 = arith.constant 0 : i32
    return %c0_i32, %c0_i32_0 : i32, i32
  }
  func.func @transform_5(%arg0: i32) -> (i32, i32) {
    %c0_i32 = arith.constant 0 : i32
    %c0_i32_0 = arith.constant 0 : i32
    %c0_i32_1 = arith.constant 0 : i32
    return %c0_i32, %c0_i32_0 : i32, i32
  }
  func.func @transform_6(%arg0: i32) -> (i32, i32) {
    %c0_i32 = arith.constant 0 : i32
    %c0_i32_0 = arith.constant 0 : i32
    %c0_i32_1 = arith.constant 0 : i32
    return %c0_i32, %c0_i32_0 : i32, i32
  }
  func.func @transform_7(%arg0: i32) -> (i32, i32) {
    %c0_i32 = arith.constant 0 : i32
    %c0_i32_0 = arith.constant 0 : i32
    return %arg0, %c0_i32 : i32, i32
  }
}

</mosaic_0001>

<bundles_post_ra>
// kernel: tpu_custom_call.1
= control target key start
LH: loop header
LB: loop body
LE: loop exit
PB: predicated region body
PF: predicated region fallthrough
CT: control target
= control target key end

     0   :  { %12 = vsyncpa [#allocation3], 0  ;;  %s959_s0 = inlined_call_operand.hbm [shape: f32[16,128], index: 0, kind: input, shape index: {}]   ;;  %s960_s1 = inlined_call_operand.hbm [shape: f32[128,128], index: 1, kind: input, shape index: {}]   ;;  %s961_s2 = inlined_call_operand.vmem [shape: f32[1,128], index: 2, kind: input, shape index: {}]   ;;  %s962_s3 = inlined_call_operand.hbm [shape: f32[128,128], index: 3, kind: input, shape index: {}]   ;;  %s963_s4 = inlined_call_operand.vmem [shape: f32[1,128], index: 4, kind: input, shape index: {}]   ;;  %s964_s5 = inlined_call_operand.hbm [shape: f32[128,128], index: 5, kind: input, shape index: {}]   ;;  %s965_s6 = inlined_call_operand.vmem [shape: f32[1,128], index: 6, kind: input, shape index: {}]   ;;  %s966_s7 = inlined_call_operand.hbm [shape: f32[16,128], index: 7, kind: output, shape index: {}]  }
   0x1   :  { %13 = vsyncpa [#allocation6], 0 }
   0x2   :  { %14 = vsyncpa [#allocation9], 0 }
   0x3   :  { %15 = vsyncpa [#allocation4], 0  ;;  %s814_s24 = smov [#allocation5]   ;;  %s815_s26 = smov [#allocation2]  }
   0x4   :  { %s33_s25 = sshll.u32 %s814_s24, 4  ;;  %s21_s27 = sshll.u32 %s815_s26, 4  ;;  %s34_s25 = int_to_ptr.vmem [resolvable:$true] %s33_s25  ;;  %s861_s27 = int_to_ptr.vmem [resolvable:$true] %s21_s27 }
   0x5   :  { %s696_s30 = scalar_lea.hbm %s960_s1, 2048 }
   0x6   :  { %p697_p0 = scmp.ne.s32.totalorder %s960_s1, %s696_s30  ;;  %p700_p1 = scmp.lt.u32.totalorder %s696_s30, %s960_s1 }
   0x8   :  { %p702_p2 = pnand %p700_p1, %p697_p0 }
   0xa   :  { %705 = shalt.err (!%p702_p2)
}
   0xb   :  { %s706_s12 = scalar_lea.vmem %s34_s25, 2048  ;;  %p711_p4 = scmp.lt.s32.totalorder %s34_s25, %s34_s25 }
   0xc   :  { %p707_p3 = scmp.ne.s32.totalorder %s34_s25, %s706_s12  ;;  %p712_p5 = scmp.lt.s32.totalorder %s706_s12, %s706_s12 }
   0xe   :  { %p713_p6 = por %p712_p5, %p711_p4 }
  0x10   :  { %p714_p7 = pnand %p713_p6, %p707_p3 }
  0x12   :  { %717 = shalt.err (!%p714_p7)
}
  0x13   :  { %s816_s13 = smov 128   ;;  %s817_s14 = smov 8  }
  0x14   :  { %39 = dma.hbm_to_vmem [thread:$0]  %s960_s1, 2048, %s34_s25, [#allocation6], %s816_s13, %s816_s13, %s817_s14  }
  0x15   :  { %s718_s19 = scalar_lea.hbm %s959_s0, 256 }
  0x16   :  { %p719_p8 = scmp.ne.s32.totalorder %s959_s0, %s718_s19  ;;  %p722_p9 = scmp.lt.u32.totalorder %s718_s19, %s959_s0 }
  0x18   :  { %p724_p10 = pnand %p722_p9, %p719_p8 }
  0x1a   :  { %727 = shalt.err (!%p724_p10)
}
  0x1b   :  { %s728_s24 = scalar_lea.vmem %s861_s27, 256  ;;  %p733_p12 = scmp.lt.s32.totalorder %s861_s27, %s861_s27 }
  0x1c   :  { %p729_p11 = scmp.ne.s32.totalorder %s861_s27, %s728_s24  ;;  %p734_p13 = scmp.lt.s32.totalorder %s728_s24, %s728_s24 }
  0x1e   :  { %p735_p0 = por %p734_p13, %p733_p12 }
  0x20   :  { %p736_p1 = pnand %p735_p0, %p729_p11 }
  0x22   :  { %739 = shalt.err (!%p736_p1)
}
  0x23   :  { %27 = dma.hbm_to_vmem [thread:$0]  %s959_s0, 256, %s861_s27, [#allocation3], %s816_s13, %s816_s13, %s817_s14  }
  0x24   :  { %s818_s26 = smov [#allocation7]   ;;  %s819_s29 = smov [#allocation8]  }
  0x25   :  { %s47_s28 = sshll.u32 %s818_s26, 4  ;;  %s61_s30 = sshll.u32 %s819_s29, 4  ;;  %s48_s28 = int_to_ptr.vmem [resolvable:$true] %s47_s28  ;;  %s898_s30 = int_to_ptr.vmem [resolvable:$true] %s61_s30 }
  0x26   :  { %s740_s10 = scalar_lea.hbm %s962_s3, 2048 }
  0x27   :  { %p741_p2 = scmp.ne.s32.totalorder %s962_s3, %s740_s10  ;;  %p744_p3 = scmp.lt.u32.totalorder %s740_s10, %s962_s3 }
  0x29   :  { %p746_p4 = pnand %p744_p3, %p741_p2 }
  0x2b   :  { %749 = shalt.err (!%p746_p4)
}
  0x2c   :  { %s750_s0 = scalar_lea.vmem %s48_s28, 2048  ;;  %p755_p6 = scmp.lt.s32.totalorder %s48_s28, %s48_s28 }
  0x2d   :  { %p751_p5 = scmp.ne.s32.totalorder %s48_s28, %s750_s0  ;;  %p756_p7 = scmp.lt.s32.totalorder %s750_s0, %s750_s0 }
  0x2f   :  { %p757_p8 = por %p756_p7, %p755_p6 }
  0x31   :  { %p758_p9 = pnand %p757_p8, %p751_p5 }
  0x33   :  { %761 = shalt.err (!%p758_p9)
}
  0x34   :  { %53 = dma.hbm_to_vmem [thread:$0]  %s962_s3, 2048, %s48_s28, [#allocation6], %s816_s13, %s816_s13, %s817_s14  }
  0x35   :  { %s762_s20 = scalar_lea.hbm %s964_s5, 2048 }
  0x36   :  { %p763_p10 = scmp.ne.s32.totalorder %s964_s5, %s762_s20  ;;  %p766_p11 = scmp.lt.u32.totalorder %s762_s20, %s964_s5 }
  0x38   :  { %p768_p12 = pnand %p766_p11, %p763_p10 }
  0x3a   :  { %771 = shalt.err (!%p768_p12)
}
  0x3b   :  { %s772_s1 = scalar_lea.vmem %s898_s30, 2048  ;;  %p777_p0 = scmp.lt.s32.totalorder %s898_s30, %s898_s30 }
  0x3c   :  { %p773_p13 = scmp.ne.s32.totalorder %s898_s30, %s772_s1  ;;  %p778_p1 = scmp.lt.s32.totalorder %s772_s1, %s772_s1 }
  0x3e   :  { %p779_p2 = por %p778_p1, %p777_p0 }
  0x40   :  { %p780_p3 = pnand %p779_p2, %p773_p13 }
  0x42   :  { %783 = shalt.err (!%p780_p3)
}
  0x43   :  { %67 = dma.hbm_to_vmem [thread:$0]  %s964_s5, 2048, %s898_s30, [#allocation9], %s816_s13, %s816_s13, %s817_s14  }
  0x44   :  { %806 = dma.done.wait [#allocation3], 256  }
  0x45   :  { %807 = vsyncadd [#allocation3], 4294967040 }
  0x46   :  { %808 = dma.done.wait [#allocation6], 4096  }
  0x47   :  { %809 = vsyncadd [#allocation6], 4294963200 }
  0x48   :  { %810 = dma.done.wait [#allocation9], 2048  }
  0x49   :  { %811 = vsyncadd [#allocation9], 4294965248  ;;  %v84_v0 = vld [vmem:[#allocation5] sm:$0xff]  ;;  %v85_v1 = vld [vmem:[#allocation5 + $0x8] sm:$0xff] }
  0x4a   :  { %v86_v2 = vld [vmem:[#allocation5 + $0x10] sm:$0xff]  ;;  %v585_v3 = vpack.c.bf16 %v85_v1, %v84_v0  ;;  %v87_v4 = vld [vmem:[#allocation5 + $0x18] sm:$0xff]  ;;  %v88_v6 = vld [vmem:[#allocation5 + $0x20] sm:$0xff] }
  0x4b   :  { %v589_v5 = vpack.c.bf16 %v87_v4, %v86_v2  ;;  %v89_v7 = vld [vmem:[#allocation5 + $0x28] sm:$0xff]  ;;  %v90_v9 = vld [vmem:[#allocation5 + $0x30] sm:$0xff]  ;;  %v91_v10 = vld [vmem:[#allocation5 + $0x38] sm:$0xff] }
  0x4c   :  { %586 = vmatprep.subr.bf16.mxu0 %v585_v3  ;;  %v593_v8 = vpack.c.bf16 %v89_v7, %v88_v6  ;;  %v82_v11 = vld [vmem:[#allocation2] sm:$0xff]  ;;  %v184_v12 = vld [vmem:[#allocation7] sm:$0xff]  ;;  %v185_v13 = vld [vmem:[#allocation7 + $0x8] sm:$0xff]  ;;  %v597_v20 = vpack.c.bf16 %v91_v10, %v90_v9 }
  0x4d   :  { %588 = vmatpush3.bf16.msra.mxu0 %v585_v3  ;;  %512 = vmatprep.mubr.f32.mxu0 %v82_v11  ;;  %v186_v14 = vld [vmem:[#allocation7 + $0x10] sm:$0xff]  ;;  %v617_v15 = vpack.c.bf16 %v185_v13, %v184_v12  ;;  %v187_v16 = vld [vmem:[#allocation7 + $0x18] sm:$0xff]  ;;  %v188_v18 = vld [vmem:[#allocation7 + $0x20] sm:$0xff] }
  0x4e   :  { %590 = vmatprep.subr.bf16.mxu0 %v589_v5  ;;  %v621_v17 = vpack.c.bf16 %v187_v16, %v186_v14  ;;  %v189_v19 = vld [vmem:[#allocation7 + $0x28] sm:$0xff]  ;;  %v92_v21 = vld [vmem:[#allocation5 + $0x40] sm:$0xff]  ;;  %v190_v24 = vld [vmem:[#allocation7 + $0x30] sm:$0xff] }
  0x4f   :  { %618 = vmatprep.subr.bf16.mxu1 %v617_v15  ;;  %v93_v22 = vld [vmem:[#allocation5 + $0x48] sm:$0xff]  ;;  %v625_v23 = vpack.c.bf16 %v189_v19, %v188_v18  ;;  %v191_v25 = vld [vmem:[#allocation7 + $0x38] sm:$0xff]  ;;  %v94_v27 = vld [vmem:[#allocation5 + $0x50] sm:$0xff] }
  0x50   :  { %620 = vmatpush3.bf16.msra.mxu1 %v617_v15  ;;  %v601_v26 = vpack.c.bf16 %v93_v22, %v92_v21  ;;  %v95_v28 = vld [vmem:[#allocation5 + $0x58] sm:$0xff]  ;;  %v629_v29 = vpack.c.bf16 %v191_v25, %v190_v24  ;;  %v192_v30 = vld [vmem:[#allocation7 + $0x40] sm:$0xff]  ;;  %v193_v31 = vld [vmem:[#allocation7 + $0x48] sm:$0xff] }
  0x51   :  { %592 = vmatpush3.bf16.msra.mxu0 %v589_v5  ;;  %622 = vmatprep.subr.bf16.mxu1 %v621_v17  ;;  %v605_v32 = vpack.c.bf16 %v95_v28, %v94_v27  ;;  %v96_v33 = vld [vmem:[#allocation5 + $0x60] sm:$0xff]  ;;  %v97_v34 = vld [vmem:[#allocation5 + $0x68] sm:$0xff]  ;;  %v633_v35 = vpack.c.bf16 %v193_v31, %v192_v30  ;;  %v194_v36 = vld [vmem:[#allocation7 + $0x50] sm:$0xff] }
  0x52   :  { %594 = vmatprep.subr.bf16.mxu0 %v593_v8  ;;  %v195_v37 = vld [vmem:[#allocation7 + $0x58] sm:$0xff]  ;;  %v609_v38 = vpack.c.bf16 %v97_v34, %v96_v33  ;;  %v98_v39 = vld [vmem:[#allocation5 + $0x70] sm:$0xff]  ;;  %v196_v42 = vld [vmem:[#allocation7 + $0x60] sm:$0xff] }
  0x53   :  { %v99_v40 = vld [vmem:[#allocation5 + $0x78] sm:$0xff]  ;;  %v637_v41 = vpack.c.bf16 %v195_v37, %v194_v36  ;;  %v197_v43 = vld [vmem:[#allocation7 + $0x68] sm:$0xff]  ;;  %v198_v47 = vld [vmem:[#allocation7 + $0x70] sm:$0xff] }
  0x54   :  { %624 = vmatpush3.bf16.msra.mxu1 %v621_v17  ;;  %v613_v44 = vpack.c.bf16 %v99_v40, %v98_v39  ;;  %v641_v45 = vpack.c.bf16 %v197_v43, %v196_v42  ;;  %v83_v46 = vld [vmem:[#allocation2 + $0x8] sm:$0xff]  ;;  %v284_v50 = vld [vmem:[#allocation8] sm:$0xff]  ;;  %v285_v51 = vld [vmem:[#allocation8 + $0x8] sm:$0xff] }
  0x55   :  { %596 = vmatpush3.bf16.msra.mxu0 %v593_v8  ;;  %626 = vmatprep.subr.bf16.mxu1 %v625_v23  ;;  %v199_v48 = vld [vmem:[#allocation7 + $0x78] sm:$0xff]  ;;  %v286_v52 = vld [vmem:[#allocation8 + $0x10] sm:$0xff]  ;;  %v649_v53 = vpack.c.bf16 %v285_v51, %v284_v50  ;;  %v288_v56 = vld [vmem:[#allocation8 + $0x20] sm:$0xff] }
  0x56   :  { %598 = vmatprep.subr.bf16.mxu0 %v597_v20  ;;  %v645_v49 = vpack.c.bf16 %v199_v48, %v198_v47  ;;  %v287_v54 = vld [vmem:[#allocation8 + $0x18] sm:$0xff]  ;;  %v289_v57 = vld [vmem:[#allocation8 + $0x28] sm:$0xff]  ;;  %v290_v59 = vld [vmem:[#allocation8 + $0x30] sm:$0xff] }
  0x57   :  { %v653_v55 = vpack.c.bf16 %v287_v54, %v286_v52  ;;  %v657_v58 = vpack.c.bf16 %v289_v57, %v288_v56  ;;  %v291_v60 = vld [vmem:[#allocation8 + $0x38] sm:$0xff]  ;;  %v292_v62 = vld [vmem:[#allocation8 + $0x40] sm:$0xff]  ;;  %v293_v63 = vld [vmem:[#allocation8 + $0x48] sm:$0xff] }
  0x58   :  { %628 = vmatpush3.bf16.msra.mxu1 %v625_v23  ;;  %v661_v61 = vpack.c.bf16 %v291_v60, %v290_v59  ;;  %v665_v0 = vpack.c.bf16 %v293_v63, %v292_v62  ;;  %v294_v1 = vld [vmem:[#allocation8 + $0x50] sm:$0xff]  ;;  %v295_v2 = vld [vmem:[#allocation8 + $0x58] sm:$0xff]  ;;  %v296_v4 = vld [vmem:[#allocation8 + $0x60] sm:$0xff] }
  0x59   :  { %600 = vmatpush3.bf16.msra.mxu0 %v597_v20  ;;  %630 = vmatprep.subr.bf16.mxu1 %v629_v29  ;;  %v669_v3 = vpack.c.bf16 %v295_v2, %v294_v1  ;;  %v297_v5 = vld [vmem:[#allocation8 + $0x68] sm:$0xff]  ;;  %v423_v7 = vld [vmem:[%s961_s2] ss:$0 sm:$0xff]  ;;  %v299_v15 = vld [vmem:[#allocation8 + $0x78] sm:$0xff] }
  0x5a   :  { %602 = vmatprep.subr.bf16.mxu0 %v601_v26  ;;  %v673_v6 = vpack.c.bf16 %v297_v5, %v296_v4  ;;  %v298_v14 = vld [vmem:[#allocation8 + $0x70] sm:$0xff] }
  0x5b   :  { %v677_v16 = vpack.c.bf16 %v299_v15, %v298_v14  ;;  %v424_v17 = vld [vmem:[%s963_s4] ss:$0 sm:$0xff]  ;;  %s820_s4 = smov [#allocation10]  }
  0x5c   :  { %632 = vmatpush3.bf16.msra.mxu1 %v629_v29  ;;  %v425_v24 = vld [vmem:[%s965_s6] ss:$0 sm:$0xff]  ;;  %s409_s6 = sshll.u32 %s820_s4, 4  ;;  %s410_s6 = int_to_ptr.vmem [resolvable:$true] %s409_s6 }
  0x5d   :  { %604 = vmatpush3.bf16.msra.mxu0 %v601_v26  ;;  %634 = vmatprep.subr.bf16.mxu1 %v633_v35  ;;  %s784_s8 = scalar_lea.vmem %s410_s6, 256  ;;  %p789_p5 = scmp.lt.s32.totalorder %s410_s6, %s410_s6 }
  0x5e   :  { %606 = vmatprep.subr.bf16.mxu0 %v605_v32  ;;  %p785_p4 = scmp.ne.s32.totalorder %s410_s6, %s784_s8  ;;  %p790_p6 = scmp.lt.s32.totalorder %s784_s8, %s784_s8 }
  0x60   :  { %636 = vmatpush3.bf16.msra.mxu1 %v633_v35  ;;  %p791_p7 = por %p790_p6, %p789_p5 }
  0x61   :  { %608 = vmatpush3.bf16.msra.mxu0 %v605_v32  ;;  %638 = vmatprep.subr.bf16.mxu1 %v637_v41 }
  0x62   :  { %610 = vmatprep.subr.bf16.mxu0 %v609_v38  ;;  %p792_p8 = pnand %p791_p7, %p785_p4 }
  0x64   :  { %640 = vmatpush3.bf16.msra.mxu1 %v637_v41 }
  0x65   :  { %612 = vmatpush3.bf16.msra.mxu0 %v609_v38  ;;  %642 = vmatprep.subr.bf16.mxu1 %v641_v45 }
  0x66   :  { %614 = vmatprep.subr.bf16.mxu0 %v613_v44 }
  0x68   :  { %644 = vmatpush3.bf16.msra.mxu1 %v641_v45 }
  0x69   :  { %616 = vmatpush3.bf16.msra.mxu0 %v613_v44  ;;  %646 = vmatprep.subr.bf16.mxu1 %v645_v49 }
  0x6a   :  { %650 = vmatprep.subr.bf16.mxu0 %v649_v53 }
  0x6c   :  { %513 = vmatmul.mubr.f32.vlgmr.msra.gmra.mrb[0].mxu0 %v83_v46  ;;  %648 = vmatpush3.bf16.msra.mxu1 %v645_v49 }
  0x6d   :  { %652 = vmatpush3.bf16.msra.mxu0 %v649_v53 }
  0x6e   :  { %654 = vmatprep.subr.bf16.mxu0 %v653_v55 }
  0x71   :  { %656 = vmatpush3.bf16.msra.mxu0 %v653_v55 }
  0x72   :  { %658 = vmatprep.subr.bf16.mxu0 %v657_v58 }
  0x75   :  { %660 = vmatpush3.bf16.msra.mxu0 %v657_v58 }
  0x76   :  { %662 = vmatprep.subr.bf16.mxu0 %v661_v61 }
  0x79   :  { %664 = vmatpush3.bf16.msra.mxu0 %v661_v61 }
  0x7a   :  { %666 = vmatprep.subr.bf16.mxu0 %v665_v0 }
  0x7d   :  { %668 = vmatpush3.bf16.msra.mxu0 %v665_v0 }
  0x7e   :  { %670 = vmatprep.subr.bf16.mxu0 %v669_v3 }
  0x81   :  { %672 = vmatpush3.bf16.msra.mxu0 %v669_v3 }
  0x82   :  { %674 = vmatprep.subr.bf16.mxu0 %v673_v6 }
  0x85   :  { %676 = vmatpush3.bf16.msra.mxu0 %v673_v6 }
  0x86   :  { %678 = vmatprep.subr.bf16.mxu0 %v677_v16 }
  0x89   :  { %680 = vmatpush3.bf16.msra.mxu0 %v677_v16 }
 0x13f   :  { %v514_v8 = vpop.f32.mrb[0].mxu0 }
 0x140   :  { %v179_v9 = vadd.f32 %v514_v8, %v423_v7  ;;  %v173_v10 = vpop.f32.mrb[1].mxu0 }
 0x141   :  { %v174_v11 = vadd.f32 %v423_v7, %v173_v10 }
 0x142   :  { %v183_v13 = vmax.f32 %v179_v9, 0.0 }
 0x143   :  { %v182_v12 = vmax.f32 %v174_v11, 0.0 }
 0x145   :  { %547 = vmatprep.mubr.f32.mxu1 %v182_v12 }
 0x146   :  { %548 = vmatmul.mubr.f32.vlgmr.msra.gmra.mrb[0].mxu1 %v183_v13 }
 0x219   :  { %v549_v18 = vpop.f32.mrb[0].mxu1 }
 0x21a   :  { %v279_v19 = vadd.f32 %v549_v18, %v424_v17  ;;  %v273_v20 = vpop.f32.mrb[1].mxu1 }
 0x21b   :  { %v274_v21 = vadd.f32 %v424_v17, %v273_v20 }
 0x21c   :  { %v283_v23 = vmax.f32 %v279_v19, 0.0 }
 0x21d   :  { %v282_v22 = vmax.f32 %v274_v21, 0.0 }
 0x21f   :  { %582 = vmatprep.mubr.f32.mxu0 %v282_v22 }
 0x220   :  { %583 = vmatmul.mubr.f32.vlgmr.msra.gmra.mrb[2].mxu0 %v283_v23 }
 0x2f3   :  { %v584_v25 = vpop.f32.mrb[2].mxu0 }
 0x2f4   :  { %v373_v26 = vpop.f32.mrb[3].mxu0  ;;  %v379_v28 = vadd.f32 %v584_v25, %v425_v24 }
 0x2f5   :  { %v374_v27 = vadd.f32 %v425_v24, %v373_v26 }
 0x2f7   :  { %382 = vmax.xlane.f32.xlu0 %v374_v27 }
 0x2fb   :  { %384 = vmax.xlane.f32.xlu0 %v379_v28 }
 0x384   :  { %v383_v29 = vpop.xlane.xlu0 %382 }
 0x385   :  { %v386_v30 = vsub.f32 %v374_v27, %v383_v29 }
 0x387   :  { %v388_v31 = vmul.f32 1.442695, %v386_v30 }
 0x388   :  { %v385_v32 = vpop.xlane.xlu0 %384 }
 0x389   :  { %v387_v33 = vsub.f32 %v379_v28, %v385_v32  ;;  %688 = vpow2.f32 %v388_v31 }
 0x38b   :  { %v390_v34 = vmul.f32 1.442695, %v387_v33 }
 0x38d   :  { %690 = vpow2.f32 %v390_v34 }
 0x393   :  { %v689_v35 = vpop.eup %688 }
 0x394   :  { %392 = vadd.xlane.f32.xlu1 %v689_v35 }
 0x397   :  { %v691_v36 = vpop.eup %690 }
 0x398   :  { %394 = vadd.xlane.f32.xlu1 %v691_v36 }
 0x421   :  { %v393_v37 = vpop.xlane.xlu1 %392 }
 0x422   :  { %692 = vlog2.f32 %v393_v37 }
 0x425   :  { %v395_v38 = vpop.xlane.xlu1 %394 }
 0x426   :  { %694 = vlog2.f32 %v395_v38 }
 0x42c   :  { %v693_v39 = vpop.eup %692 }
 0x42d   :  { %v397_v40 = vmul.f32 0.6931472, %v693_v39 }
 0x42f   :  { %v400_v41 = vsub.f32 %v386_v30, %v397_v40 }
 0x430   :  { %v695_v42 = vpop.eup %694 }
 0x431   :  { %402 = vst [vmem:[#allocation10] sm:$0xff] %v400_v41  ;;  %v399_v43 = vmul.f32 0.6931472, %v695_v42 }
 0x433   :  { %v401_v44 = vsub.f32 %v387_v33, %v399_v43 }
 0x435   :  { %403 = vst [vmem:[#allocation10 + $0x8] sm:$0xff] %v401_v44 }
 0x436   :  { %795 = shalt.err (!%p792_p8)
}
 0x437   :  { %s796_s11 = scalar_lea.hbm %s966_s7, 256 }
 0x438   :  { %p797_p9 = scmp.ne.s32.totalorder %s966_s7, %s796_s11  ;;  %p800_p10 = scmp.lt.u32.totalorder %s796_s11, %s966_s7 }
 0x43a   :  { %p802_p11 = pnand %p800_p10, %p797_p9 }
 0x43c   :  { %805 = shalt.err (!%p802_p11)
}
 0x43d   :  { %415 = dma.vmem_to_hbm [thread:$0]  %s410_s6, 256, %s966_s7, [#allocation4], %s816_s13, %s816_s13, %s817_s14  }
 0x43e   :  { %812 = dma.done.wait [#allocation4], 256  }
 0x43f   :  { %813 = vsyncadd [#allocation4], 4294967040 }
 0x440   :  { %419 = vsyncpa [#allocation3], 1 }
 0x441   :  { %420 = vsyncpa [#allocation6], 1 }
 0x442   :  { %421 = vsyncpa [#allocation9], 1 }
 0x443   :  { %422 = vsyncpa [#allocation4], 1 }

</bundles_post_ra>
